<compile_context>
chip_gen: v5e
topology: v5e:2x2
jax: 0.10.0
libtpu: 0.0.40
codegen_flags: <defaults>
</compile_context>

<pallas_src>
import random

import jax
import jax.numpy as jnp
from jax.experimental import pallas as pl
from jax.experimental.pallas import tpu as pltpu

EPS = 1e-6
RHO = 3.0

# ~2 MiB per x block  ->  pass 2 holds (x + out) * 2 buffers ~= 8 MiB in VMEM,
# comfortably under the 16 MiB (v5e) / 32 MiB (v6e/v7x) scoped-VMEM defaults.
_TARGET_BLOCK_BYTES = 2 << 20


def _stats_kernel(x_ref, stats_ref):
    """Per-row (= per (b, c)) spatial mean and unbiased variance, one sweep over x."""
    x = x_ref[...].astype(jnp.float32)
    hw = x.shape[-1]
    s = jnp.sum(x, axis=-1, keepdims=True)
    ss = jnp.sum(x * x, axis=-1, keepdims=True)
    mu = s * (1.0 / hw)
    var = (ss - hw * mu * mu) * (1.0 / (hw - 1))   # unbiased (torch default)
    var = jnp.maximum(var, 0.0)                    # guard one-sweep cancellation (var >= 0)
    stats_ref[...] = jnp.concatenate([mu, var], axis=-1)


def _affine_kernel(x_ref, scale_ref, shift_ref, o_ref):
    """out = x * scale + shift   (per-row scale/shift broadcast over spatial)."""
    x = x_ref[...].astype(jnp.float32)
    o_ref[...] = (x * scale_ref[...] + shift_ref[...]).astype(o_ref.dtype)


def _pick_row_tile(bc, hw, itemsize):
    """Rows per block targeting ~_TARGET_BLOCK_BYTES for the x tile, multiple of 8."""
    rows = (_TARGET_BLOCK_BYTES // max(1, hw * itemsize)) // 8 * 8
    rows = max(8, int(rows))
    return bc if rows >= bc else rows


def ubs_forward(x, key, p=1.0, rho=RHO, eps=EPS, training=True, donate_x=False):
    if not training:
        return x
    # Host-side Bernoulli gate, same as the reference (`random.random() > p`);
    # with the module default p=1.0 the perturbation branch always runs.
    if p < 1.0 and random.random() > p:
        return x

    B, C, H, W = x.shape
    BC, HW = B * C, H * W
    # TODO(synk): if HW % 128 != 0 (e.g. 8x8 maps), a lane-dense repack/pad of the
    # spatial axis would avoid masked partial stores in pass 2.
    x2d = x.reshape(BC, HW)

    row_tile = _pick_row_tile(BC, HW, jnp.dtype(x.dtype).itemsize)
    grid = (pl.cdiv(BC, row_tile),)
    cparams = pltpu.CompilerParams(dimension_semantics=("parallel",))

    # --- Pass 1: per-(b, c) spatial moments (Pallas, row-tiled, pipelined) ---
    stats = pl.pallas_call(
        _stats_kernel,
        out_shape=jax.ShapeDtypeStruct((BC, 2), jnp.float32),
        grid=grid,
        in_specs=[pl.BlockSpec((row_tile, HW), lambda i: (i, 0))],
        out_specs=pl.BlockSpec((row_tile, 2), lambda i: (i, 0)),
        compiler_params=cparams,
    )(x2d)

    mean = stats[:, 0].reshape(B, C)
    var = stats[:, 1].reshape(B, C)

    # --- Batch-level statistics of the per-(b, c) moments (B*C scalars, plain JAX glue) ---
    std_1 = jnp.sqrt(var)                                      # torch .std(): unbiased, no eps
    mu_mu = jnp.mean(mean, axis=0)
    mu_std = jnp.maximum(jnp.std(mean, axis=0, ddof=1), eps)   # clamp_(min=eps)
    std_mu = jnp.mean(std_1, axis=0)
    std_std = jnp.maximum(jnp.std(std_1, axis=0, ddof=1), eps)

    # Uniform(low, high) sampling of the perturbed per-sample statistics.
    k1, k2 = jax.random.split(key)
    u_mu = jax.random.uniform(k1, (B, C), dtype=jnp.float32)
    u_sig = jax.random.uniform(k2, (B, C), dtype=jnp.float32)
    mu_b = (mu_mu - rho * mu_std) + u_mu * (2.0 * rho * mu_std)
    sig_b = (std_mu - rho * std_std) + u_sig * (2.0 * rho * std_std)

    # Fold normalize + re-style into a per-row fused multiply-add:
    #   out = (x - mu) * rsqrt(var + eps) * sig_b + mu_b  ==  x * scale + shift
    inv_sig = jax.lax.rsqrt(var + eps)
    scale_bc = sig_b * inv_sig
    shift_bc = mu_b - mean * scale_bc
    scale = scale_bc.reshape(BC, 1).astype(jnp.float32)
    shift = shift_bc.reshape(BC, 1).astype(jnp.float32)

    # --- Pass 2: elementwise FMA hot path (Pallas, row-tiled, pipelined) ---
    out = pl.pallas_call(
        _affine_kernel,
        out_shape=jax.ShapeDtypeStruct((BC, HW), x.dtype),
        grid=grid,
        in_specs=[pl.BlockSpec((row_tile, HW), lambda i: (i, 0)),
                  pl.BlockSpec((row_tile, 1), lambda i: (i, 0)),
                  pl.BlockSpec((row_tile, 1), lambda i: (i, 0))],
        out_specs=pl.BlockSpec((row_tile, HW), lambda i: (i, 0)),
        compiler_params=cparams,
        # Reuse x's HBM buffer for the output when the caller no longer needs x.
        input_output_aliases=({0: 0} if donate_x else {}),
    )(x2d, scale, shift)

    return out.reshape(B, C, H, W)


if __name__ == "__main__":
    key = jax.random.PRNGKey(0)
    kx, ksample = jax.random.split(key)
    # Small NCHW input consistent with the module's expected 4-D feature map.
    x = jax.random.normal(kx, (2, 4, 16, 16), dtype=jnp.float32)

    out = ubs_forward(x, ksample, training=True)
    out = jax.block_until_ready(out)

    assert out.shape == x.shape and out.dtype == x.dtype
    assert bool(jnp.all(jnp.isfinite(out)))
    print("KERNEL_OK")
</pallas_src>

<mosaic_0001>
module attributes {stable_mosaic.version = 11 : i64} {
  func.func @_stats_kernel(%arg0: i32, %arg1: memref<8x256xf32, #tpu.memory_space<vmem>>, %arg2: memref<8x2xf32, #tpu.memory_space<vmem>>) attributes {dimension_semantics = [#tpu.dimension_semantics<parallel>], iteration_bounds = array<i64: 1>, scalar_prefetch = 0 : i64, scratch_operands = 0 : i64, tpu.core_type = #tpu.core_type<tc>, window_params = [{transform_indices = @transform_0, window_bounds = array<i64: 8, 256>}, {transform_indices = @transform_1, window_bounds = array<i64: 8, 2>}]} {
    %c0 = arith.constant 0 : index
    %c0_0 = arith.constant 0 : index
    %0 = vector.load %arg1[%c0, %c0_0] : memref<8x256xf32, #tpu.memory_space<vmem>>, vector<8x256xf32>
    %cst = arith.constant dense<0.000000e+00> : vector<8xf32>
    %1 = vector.multi_reduction <add>, %0, %cst [1] : vector<8x256xf32> to vector<8xf32>
    %2 = vector.shape_cast %1 : vector<8xf32> to vector<8x1xf32>
    %3 = arith.mulf %0, %0 : vector<8x256xf32>
    %cst_1 = arith.constant dense<0.000000e+00> : vector<8xf32>
    %4 = vector.multi_reduction <add>, %3, %cst_1 [1] : vector<8x256xf32> to vector<8xf32>
    %5 = vector.shape_cast %4 : vector<8xf32> to vector<8x1xf32>
    %cst_2 = arith.constant 3.906250e-03 : f32
    %6 = vector.broadcast %cst_2 : f32 to vector<8x1xf32>
    %7 = arith.mulf %2, %6 : vector<8x1xf32>
    %cst_3 = arith.constant 2.560000e+02 : f32
    %8 = vector.broadcast %cst_3 : f32 to vector<8x1xf32>
    %9 = arith.mulf %8, %7 : vector<8x1xf32>
    %10 = arith.mulf %9, %7 : vector<8x1xf32>
    %11 = arith.subf %5, %10 : vector<8x1xf32>
    %cst_4 = arith.constant 0.00392156886 : f32
    %12 = vector.broadcast %cst_4 : f32 to vector<8x1xf32>
    %13 = arith.mulf %11, %12 : vector<8x1xf32>
    %cst_5 = arith.constant 0.000000e+00 : f32
    %14 = vector.broadcast %cst_5 : f32 to vector<8x1xf32>
    %15 = arith.maximumf %13, %14 : vector<8x1xf32>
    %16 = tpu.concatenate %7, %15 in 1 : vector<8x1xf32>, vector<8x1xf32> -> vector<8x2xf32>
    %c0_6 = arith.constant 0 : index
    %c0_7 = arith.constant 0 : index
    %17 = vector.load %arg2[%c0_6, %c0_7] : memref<8x2xf32, #tpu.memory_space<vmem>>, vector<8x2xf32>
    tpu.vector_store %arg2[%c0_6, %c0_7], %16 {strides = array<i32>} : memref<8x2xf32, #tpu.memory_space<vmem>>, vector<8x2xf32>,
    return
  }
  func.func @transform_0(%arg0: i32) -> (i32, i32) {
    %c0_i32 = arith.constant 0 : i32
    %c0_i32_0 = arith.constant 0 : i32
    return %arg0, %c0_i32 : i32, i32
  }
  func.func @transform_1(%arg0: i32) -> (i32, i32) {
    %c0_i32 = arith.constant 0 : i32
    %c0_i32_0 = arith.constant 0 : i32
    return %arg0, %c0_i32 : i32, i32
  }
}

</mosaic_0001>

<bundles_post_ra>
// kernel: tpu_custom_call.1
= control target key start
LH: loop header
LB: loop body
LE: loop exit
PB: predicated region body
PF: predicated region fallthrough
CT: control target
= control target key end

     0   :  { %6 = vsyncpa [#allocation3], 0  ;;  %s74_s9 = smov [#allocation2]   ;;  %s91_s0 = inlined_call_operand.hbm [shape: f32[8,256], index: 0, kind: input, shape index: {}]   ;;  %s92_s1 = inlined_call_operand.vmem [shape: f32[8,2], index: 1, kind: output, shape index: {}]  }
   0x1   :  { %s12_s8 = sshll.u32 %s91_s0, 4  ;;  %s14_s10 = sshll.u32 %s74_s9, 4  ;;  %s13_s8 = int_to_ptr.hbm [resolvable:$true] %s12_s8  ;;  %s15_s10 = int_to_ptr.vmem [resolvable:$true] %s14_s10 }
   0x2   :  { %17 = dma.hbm_to_vmem [thread:$0]  %s13_s8, 256, %s15_s10, [#allocation3]  }
   0x3   :  { %72 = dma.done.wait [#allocation3], 256  }
   0x4   :  { %73 = vsyncadd [#allocation3], 4294967040  ;;  %v22_v0 = vld [vmem:[#allocation2] sm:$0xff]  ;;  %v23_v1 = vld [vmem:[#allocation2 + $0x8] sm:$0xff]  ;;  %vm38_vm0 = vcmask 7168   ;;  %vm40_vm1 = vcmask 15360  }
   0x5   :  { %v24_v2 = vadd.f32 %v23_v1, %v22_v0  ;;  %v27_v3 = vmul.f32 %v22_v0, %v22_v0  ;;  %v28_v4 = vmul.f32 %v23_v1, %v23_v1 }
   0x7   :  { %25 = vadd.xlane.f32.xlu0 %v24_v2  ;;  %v29_v5 = vadd.f32 %v28_v4, %v27_v3 }
   0xf   :  { %30 = vadd.xlane.f32.xlu0 %v29_v5 }
  0x7a   :  { %v26_v6 = vpop.xlane.xlu0 %25 }
  0x7b   :  { %v32_v7 = vmul.f32 0.00390625, %v26_v6 }
  0x7d   :  { %v33_v8 = vmul.f32 256.0, %v32_v7 }
  0x7f   :  { %v34_v9 = vmul.f32 %v33_v8, %v32_v7 }
  0x82   :  { %v31_v10 = vpop.xlane.xlu0 %30 }
  0x83   :  { %v35_v11 = vsub.f32 %v31_v10, %v34_v9 }
  0x85   :  { %v36_v12 = vmul.f32 0.003921569, %v35_v11 }
  0x87   :  { %v37_v13 = vmax.f32 %v36_v12, 0.0 }
  0x89   :  { %v39_v14 = vsel %vm38_vm0, %v32_v7, %v37_v13 }
  0x8a   :  { %41 = vst.msk [vmem:[%s92_s1] sm:$0xff] %vm40_vm1, %v39_v14 }
  0x8b   :  { %46 = vsyncpa [#allocation3], 1 }

</bundles_post_ra>
